<compile_context>
chip_gen: v5e
topology: v5e:2x2
jax: 0.10.0
libtpu: 0.0.40
codegen_flags: <defaults>
</compile_context>

<pallas_src>
import jax
import jax.numpy as jnp
from jax.experimental import pallas as pl
from jax.experimental.pallas import tpu as pltpu

_VMEM = pl.BlockSpec(memory_space=pltpu.MemorySpace.VMEM)
_EPS = 1e-5


def _bn_flat(h, nblk, c):
    """Training-mode BatchNorm1d (gamma=1, beta=0, biased batch variance, eps=1e-5)
    on a channels-last *flat* activation h of shape (B, nblk*c): channel `ch` of
    position `i` lives at column i*c + ch.  Stats are taken over (batch, length)."""
    n = h.shape[0] * nblk
    blocks = [h[:, i * c:(i + 1) * c] for i in range(nblk)]     # static lane slices
    tot = blocks[0]
    for blk in blocks[1:]:
        tot = tot + blk
    mean = jnp.sum(tot, axis=0, keepdims=True) * (1.0 / n)       # (1, c)
    var = jnp.zeros_like(mean)
    for blk in blocks:
        d = blk - mean
        var = var + jnp.sum(d * d, axis=0, keepdims=True)
    var = var * (1.0 / n)
    inv = jax.lax.rsqrt(var + _EPS)                              # (1, c)
    return jnp.concatenate([(blk - mean) * inv for blk in blocks], axis=-1)


def _make_fused_kernel(num_layers, H4, K, C1, C2):
    L2 = 2 * K - 1            # length after second ConvTranspose1d

    def kernel(*refs):
        it = iter(refs)
        # ---------------- inputs ----------------
        x0_ref = next(it)        # (B, Din)            input_data[:, :, 0]
        noise_ref = next(it)     # (B, Din)            noise_input[:, :, 0]
        h0_ref = next(it)        # (num_layers, B, H4) noise_gru
        gru_refs = [tuple(next(it) for _ in range(4)) for _ in range(num_layers)]
        w1n_ref = next(it)       # (Din,   K*C1)   conv1 Toeplitz rows for noise channels
        w1g_ref = next(it)       # (H4,    K*C1)   conv1 Toeplitz rows for GRU channels
        w2_ref = next(it)        # (K*C1,  L2*C2)
        w3_ref = next(it)        # (L2*C2, L3*Cout)
        out_ref = next(it)       # (B, L3*Cout)

        # ------------- GRU, single timestep, stacked layers (2 MXU dots / layer) -------------
        x = x0_ref[...]                                   # (B, Din)
        for l in range(num_layers):
            wi_ref, bi_ref, wh_ref, bh_ref = gru_refs[l]
            h = h0_ref[l]                                 # (B, H4)
            gi = jnp.dot(x, wi_ref[...], preferred_element_type=jnp.float32) + bi_ref[...]
            gh = jnp.dot(h, wh_ref[...], preferred_element_type=jnp.float32) + bh_ref[...]
            r = jax.nn.sigmoid(gi[:, 0 * H4:1 * H4] + gh[:, 0 * H4:1 * H4])
            z = jax.nn.sigmoid(gi[:, 1 * H4:2 * H4] + gh[:, 1 * H4:2 * H4])
            n = jnp.tanh(gi[:, 2 * H4:3 * H4] + r * gh[:, 2 * H4:3 * H4])
            x = (1.0 - z) * n + z * h                     # layer output == new hidden
        gru_last = x                                      # (B, H4)

        # ---- ConvTranspose1d #1 (Lin == 1): single dot per input group; concat with
        # noise never materialises (weight rows split at init). BN follows; LeakyReLU(True)
        # has slope 1.0 == identity -> dropped.
        h1 = (jnp.dot(noise_ref[...], w1n_ref[...], preferred_element_type=jnp.float32)
              + jnp.dot(gru_last, w1g_ref[...], preferred_element_type=jnp.float32))
        h1 = _bn_flat(h1, K, C1)                          # (B, K*C1)

        # ---- ConvTranspose1d #2 as one block-Toeplitz dot + BN ----
        h2 = jnp.dot(h1, w2_ref[...], preferred_element_type=jnp.float32)
        h2 = _bn_flat(h2, L2, C2)                         # (B, L2*C2)

        # ---- ConvTranspose1d #3 as one block-Toeplitz dot + Tanh ----
        out_ref[...] = jnp.tanh(
            jnp.dot(h2, w3_ref[...], preferred_element_type=jnp.float32))

    return kernel


# ------------------------------- full forward -------------------------------
def generator_v3_forward(params, input_data, noise_gru, noise_input):
    """input_data: (B, input_dim, 1) NCL.  Returns (B, output_dim, 1 + 3*(K-1)) NCL."""
    B, Din, L = input_data.shape
    assert L == 1, "torch.cat in GeneratorV3.forward requires sequence length 1"
    num_layers, _, H4 = noise_gru.shape
    K = params["kernel_size"]
    C1 = params["w1_gru"].shape[1] // K
    L2 = 2 * K - 1
    C2 = params["w2"].shape[1] // L2
    Lout = 3 * (K - 1) + 1
    Cout = params["w3"].shape[1] // Lout

    kernel = _make_fused_kernel(num_layers, H4, K, C1, C2)

    flat_gru = []
    for p in params["gru"]:
        flat_gru += [p["w_i"], p["b_i"], p["w_h"], p["b_h"]]
    inputs = (input_data[:, :, 0], noise_input[:, :, 0], noise_gru,
              *flat_gru,
              params["w1_noise"], params["w1_gru"], params["w2"], params["w3"])

    # TODO(synk): at production batch sizes add a leading grid axis over batch with
    # dimension_semantics=("parallel",) so both v7x TensorCores are used; at B=2 a
    # single invocation with everything resident in VMEM is optimal.
    out_flat = pl.pallas_call(
        kernel,
        out_shape=jax.ShapeDtypeStruct((B, Lout * Cout), jnp.float32),
        in_specs=[_VMEM] * len(inputs),
        out_specs=_VMEM,
    )(*inputs)
    # channels-last flat -> (B, Lout, Cout) -> PyTorch NCL (B, Cout, Lout)
    return jnp.transpose(out_flat.reshape(B, Lout, Cout), (0, 2, 1))


# --------------------------- deterministic init ------------------------------
def _toeplitz_ct(w, lin):
    """w: (K, Cin, Cout) with w[k, ci, co] == torch ConvTranspose1d weight[ci, co, k].
    Returns the (lin*Cin, lout*Cout) block-Toeplitz matrix turning the stride-1,
    pad-0 ConvTranspose1d into a single channels-last-flat matmul."""
    K, Cin, Cout = w.shape
    lout = lin + K - 1
    full = jnp.zeros((lin * Cin, lout * Cout), jnp.float32)
    for t in range(lin):
        for k in range(K):
            full = full.at[t * Cin:(t + 1) * Cin,
                           (t + k) * Cout:(t + k + 1) * Cout].set(w[k])
    return full


def init_params(key, input_dim, hidden_dim, output_dim, num_layers, kernel_size):
    H4 = hidden_dim * 4
    keys = iter(jax.random.split(key, num_layers * 4 + 3))
    bound = 1.0 / (H4 ** 0.5)
    gru = []
    for l in range(num_layers):
        din = input_dim if l == 0 else H4
        w_ih = jax.random.uniform(next(keys), (3 * H4, din), jnp.float32, -bound, bound)
        w_hh = jax.random.uniform(next(keys), (3 * H4, H4), jnp.float32, -bound, bound)
        b_ih = jax.random.uniform(next(keys), (3 * H4,), jnp.float32, -bound, bound)
        b_hh = jax.random.uniform(next(keys), (3 * H4,), jnp.float32, -bound, bound)
        # PyTorch gate order along the 3*H4 axis: [r | z | n]
        gru.append(dict(w_i=w_ih.T, b_i=b_ih[None, :], w_h=w_hh.T, b_h=b_hh[None, :]))

    C0 = H4 + input_dim
    C1 = hidden_dim * 2
    C2 = hidden_dim
    K = kernel_size
    L2 = 2 * K - 1

    def conv_w(k, cin, cout):
        b = 1.0 / ((cin * K) ** 0.5)
        # stored as (K, Cin, Cout): w[k, ci, co] == torch weight[ci, co, k]
        return jax.random.uniform(k, (K, cin, cout), jnp.float32, -b, b)

    w1 = conv_w(next(keys), C0, C1)   # input channels ordered [noise(Din) | gru(H4)]
    w2 = conv_w(next(keys), C1, C2)
    w3 = conv_w(next(keys), C2, output_dim)

    w1_full = _toeplitz_ct(w1, 1)                         # (C0, K*C1)
    return dict(
        kernel_size=K,
        gru=gru,
        # torch.cat((noise_input, gru_out), dim=1): noise channels first, then GRU.
        w1_noise=w1_full[:input_dim],                     # (Din, K*C1)
        w1_gru=w1_full[input_dim:],                       # (H4,  K*C1)
        w2=_toeplitz_ct(w2, K),                           # (K*C1,  L2*C2)
        w3=_toeplitz_ct(w3, L2),                          # (L2*C2, L3*Cout)
    )


if __name__ == "__main__":
    B, input_dim, hidden_dim, output_dim = 2, 4, 8, 4
    num_layers, dropout, kernel_size = 2, 0.0, 3   # dropout=0 -> GRU dropout is a no-op

    key = jax.random.PRNGKey(0)
    kp, kx, kg, kn = jax.random.split(key, 4)
    input_data = jax.random.normal(kx, (B, input_dim, 1), jnp.float32)            # NCL, L must be 1
    noise_gru = jax.random.normal(kg, (num_layers, B, hidden_dim * 4), jnp.float32)
    noise_input = jax.random.normal(kn, input_data.shape, jnp.float32)
    params = init_params(kp, input_dim, hidden_dim, output_dim, num_layers, kernel_size)

    out = generator_v3_forward(params, input_data, noise_gru, noise_input)
    out = jax.block_until_ready(out)

    expected = (B, output_dim, 1 + 3 * (kernel_size - 1))
    assert out.shape == expected, (out.shape, expected)
    assert bool(jnp.all(jnp.isfinite(out)))
    assert bool(jnp.all(jnp.abs(out) <= 1.0))     # final Tanh bound
    print("KERNEL_OK")
</pallas_src>

<mosaic_0001>
module attributes {stable_mosaic.version = 11 : i64} {
  func.func @kernel(%arg0: memref<2x4xf32, #tpu.memory_space<vmem>>, %arg1: memref<2x4xf32, #tpu.memory_space<vmem>>, %arg2: memref<2x2x32xf32, #tpu.memory_space<vmem>>, %arg3: memref<4x96xf32, #tpu.memory_space<vmem>>, %arg4: memref<1x96xf32, #tpu.memory_space<vmem>>, %arg5: memref<32x96xf32, #tpu.memory_space<vmem>>, %arg6: memref<1x96xf32, #tpu.memory_space<vmem>>, %arg7: memref<32x96xf32, #tpu.memory_space<vmem>>, %arg8: memref<1x96xf32, #tpu.memory_space<vmem>>, %arg9: memref<32x96xf32, #tpu.memory_space<vmem>>, %arg10: memref<1x96xf32, #tpu.memory_space<vmem>>, %arg11: memref<4x48xf32, #tpu.memory_space<vmem>>, %arg12: memref<32x48xf32, #tpu.memory_space<vmem>>, %arg13: memref<48x40xf32, #tpu.memory_space<vmem>>, %arg14: memref<40x28xf32, #tpu.memory_space<vmem>>, %arg15: memref<2x28xf32, #tpu.memory_space<vmem>>) attributes {dimension_semantics = [], scalar_prefetch = 0 : i64, scratch_operands = 0 : i64, tpu.core_type = #tpu.core_type<tc>} {
    %c0 = arith.constant 0 : index
    %c0_0 = arith.constant 0 : index
    %0 = vector.load %arg0[%c0, %c0_0] : memref<2x4xf32, #tpu.memory_space<vmem>>, vector<2x4xf32>
    %c0_1 = arith.constant 0 : index
    %c0_2 = arith.constant 0 : index
    %c0_3 = arith.constant 0 : index
    %1 = vector.load %arg2[%c0_1, %c0_2, %c0_3] : memref<2x2x32xf32, #tpu.memory_space<vmem>>, vector<1x2x32xf32>
    %2 = vector.shape_cast %1 : vector<1x2x32xf32> to vector<2x32xf32>
    %c0_4 = arith.constant 0 : index
    %c0_5 = arith.constant 0 : index
    %3 = vector.load %arg3[%c0_4, %c0_5] : memref<4x96xf32, #tpu.memory_space<vmem>>, vector<4x96xf32>
    %cst = arith.constant dense<0.000000e+00> : vector<2x96xf32>
    %4 = tpu.matmul %0, %3, %cst {dimension_numbers = #tpu.dot_dimension_numbers<[1], [0], [0], [1], [0, 0, 1, 1], [], []>} : vector<2x4xf32>, vector<4x96xf32>, vector<2x96xf32> -> vector<2x96xf32>
    %c0_6 = arith.constant 0 : index
    %c0_7 = arith.constant 0 : index
    %5 = vector.load %arg4[%c0_6, %c0_7] : memref<1x96xf32, #tpu.memory_space<vmem>>, vector<1x96xf32>
    %6 = vector.broadcast %5 : vector<1x96xf32> to vector<2x96xf32>
    %7 = arith.addf %4, %6 : vector<2x96xf32>
    %c0_8 = arith.constant 0 : index
    %c0_9 = arith.constant 0 : index
    %8 = vector.load %arg5[%c0_8, %c0_9] : memref<32x96xf32, #tpu.memory_space<vmem>>, vector<32x96xf32>
    %cst_10 = arith.constant dense<0.000000e+00> : vector<2x96xf32>
    %9 = tpu.matmul %2, %8, %cst_10 {dimension_numbers = #tpu.dot_dimension_numbers<[1], [0], [0], [1], [0, 0, 1, 1], [], []>} : vector<2x32xf32>, vector<32x96xf32>, vector<2x96xf32> -> vector<2x96xf32>
    %c0_11 = arith.constant 0 : index
    %c0_12 = arith.constant 0 : index
    %10 = vector.load %arg6[%c0_11, %c0_12] : memref<1x96xf32, #tpu.memory_space<vmem>>, vector<1x96xf32>
    %11 = vector.broadcast %10 : vector<1x96xf32> to vector<2x96xf32>
    %12 = arith.addf %9, %11 : vector<2x96xf32>
    %13 = vector.extract_strided_slice %7 {offsets = [0, 0], sizes = [2, 32], strides = [1, 1]} : vector<2x96xf32> to vector<2x32xf32>
    %14 = vector.extract_strided_slice %12 {offsets = [0, 0], sizes = [2, 32], strides = [1, 1]} : vector<2x96xf32> to vector<2x32xf32>
    %15 = arith.addf %13, %14 : vector<2x32xf32>
    %16 = arith.negf %15 : vector<2x32xf32>
    %17 = math.exp %16 : vector<2x32xf32>
    %cst_13 = arith.constant 1.000000e+00 : f32
    %18 = vector.broadcast %cst_13 : f32 to vector<2x32xf32>
    %19 = arith.addf %18, %17 : vector<2x32xf32>
    %20 = arith.divf %18, %19 : vector<2x32xf32>
    %21 = vector.extract_strided_slice %7 {offsets = [0, 32], sizes = [2, 32], strides = [1, 1]} : vector<2x96xf32> to vector<2x32xf32>
    %22 = vector.extract_strided_slice %12 {offsets = [0, 32], sizes = [2, 32], strides = [1, 1]} : vector<2x96xf32> to vector<2x32xf32>
    %23 = arith.addf %21, %22 : vector<2x32xf32>
    %24 = arith.negf %23 : vector<2x32xf32>
    %25 = math.exp %24 : vector<2x32xf32>
    %cst_14 = arith.constant 1.000000e+00 : f32
    %26 = vector.broadcast %cst_14 : f32 to vector<2x32xf32>
    %27 = arith.addf %26, %25 : vector<2x32xf32>
    %28 = arith.divf %26, %27 : vector<2x32xf32>
    %29 = vector.extract_strided_slice %7 {offsets = [0, 64], sizes = [2, 32], strides = [1, 1]} : vector<2x96xf32> to vector<2x32xf32>
    %30 = vector.extract_strided_slice %12 {offsets = [0, 64], sizes = [2, 32], strides = [1, 1]} : vector<2x96xf32> to vector<2x32xf32>
    %31 = arith.mulf %20, %30 : vector<2x32xf32>
    %32 = arith.addf %29, %31 : vector<2x32xf32>
    %33 = math.tanh %32 : vector<2x32xf32>
    %cst_15 = arith.constant 1.000000e+00 : f32
    %34 = vector.broadcast %cst_15 : f32 to vector<2x32xf32>
    %35 = arith.subf %34, %28 : vector<2x32xf32>
    %36 = arith.mulf %35, %33 : vector<2x32xf32>
    %37 = arith.mulf %28, %2 : vector<2x32xf32>
    %38 = arith.addf %36, %37 : vector<2x32xf32>
    %c1 = arith.constant 1 : index
    %c0_16 = arith.constant 0 : index
    %c0_17 = arith.constant 0 : index
    %39 = vector.load %arg2[%c1, %c0_16, %c0_17] : memref<2x2x32xf32, #tpu.memory_space<vmem>>, vector<1x2x32xf32>
    %40 = vector.shape_cast %39 : vector<1x2x32xf32> to vector<2x32xf32>
    %c0_18 = arith.constant 0 : index
    %c0_19 = arith.constant 0 : index
    %41 = vector.load %arg7[%c0_18, %c0_19] : memref<32x96xf32, #tpu.memory_space<vmem>>, vector<32x96xf32>
    %cst_20 = arith.constant dense<0.000000e+00> : vector<2x96xf32>
    %42 = tpu.matmul %38, %41, %cst_20 {dimension_numbers = #tpu.dot_dimension_numbers<[1], [0], [0], [1], [0, 0, 1, 1], [], []>} : vector<2x32xf32>, vector<32x96xf32>, vector<2x96xf32> -> vector<2x96xf32>
    %c0_21 = arith.constant 0 : index
    %c0_22 = arith.constant 0 : index
    %43 = vector.load %arg8[%c0_21, %c0_22] : memref<1x96xf32, #tpu.memory_space<vmem>>, vector<1x96xf32>
    %44 = vector.broadcast %43 : vector<1x96xf32> to vector<2x96xf32>
    %45 = arith.addf %42, %44 : vector<2x96xf32>
    %c0_23 = arith.constant 0 : index
    %c0_24 = arith.constant 0 : index
    %46 = vector.load %arg9[%c0_23, %c0_24] : memref<32x96xf32, #tpu.memory_space<vmem>>, vector<32x96xf32>
    %cst_25 = arith.constant dense<0.000000e+00> : vector<2x96xf32>
    %47 = tpu.matmul %40, %46, %cst_25 {dimension_numbers = #tpu.dot_dimension_numbers<[1], [0], [0], [1], [0, 0, 1, 1], [], []>} : vector<2x32xf32>, vector<32x96xf32>, vector<2x96xf32> -> vector<2x96xf32>
    %c0_26 = arith.constant 0 : index
    %c0_27 = arith.constant 0 : index
    %48 = vector.load %arg10[%c0_26, %c0_27] : memref<1x96xf32, #tpu.memory_space<vmem>>, vector<1x96xf32>
    %49 = vector.broadcast %48 : vector<1x96xf32> to vector<2x96xf32>
    %50 = arith.addf %47, %49 : vector<2x96xf32>
    %51 = vector.extract_strided_slice %45 {offsets = [0, 0], sizes = [2, 32], strides = [1, 1]} : vector<2x96xf32> to vector<2x32xf32>
    %52 = vector.extract_strided_slice %50 {offsets = [0, 0], sizes = [2, 32], strides = [1, 1]} : vector<2x96xf32> to vector<2x32xf32>
    %53 = arith.addf %51, %52 : vector<2x32xf32>
    %54 = arith.negf %53 : vector<2x32xf32>
    %55 = math.exp %54 : vector<2x32xf32>
    %cst_28 = arith.constant 1.000000e+00 : f32
    %56 = vector.broadcast %cst_28 : f32 to vector<2x32xf32>
    %57 = arith.addf %56, %55 : vector<2x32xf32>
    %58 = arith.divf %56, %57 : vector<2x32xf32>
    %59 = vector.extract_strided_slice %45 {offsets = [0, 32], sizes = [2, 32], strides = [1, 1]} : vector<2x96xf32> to vector<2x32xf32>
    %60 = vector.extract_strided_slice %50 {offsets = [0, 32], sizes = [2, 32], strides = [1, 1]} : vector<2x96xf32> to vector<2x32xf32>
    %61 = arith.addf %59, %60 : vector<2x32xf32>
    %62 = arith.negf %61 : vector<2x32xf32>
    %63 = math.exp %62 : vector<2x32xf32>
    %cst_29 = arith.constant 1.000000e+00 : f32
    %64 = vector.broadcast %cst_29 : f32 to vector<2x32xf32>
    %65 = arith.addf %64, %63 : vector<2x32xf32>
    %66 = arith.divf %64, %65 : vector<2x32xf32>
    %67 = vector.extract_strided_slice %45 {offsets = [0, 64], sizes = [2, 32], strides = [1, 1]} : vector<2x96xf32> to vector<2x32xf32>
    %68 = vector.extract_strided_slice %50 {offsets = [0, 64], sizes = [2, 32], strides = [1, 1]} : vector<2x96xf32> to vector<2x32xf32>
    %69 = arith.mulf %58, %68 : vector<2x32xf32>
    %70 = arith.addf %67, %69 : vector<2x32xf32>
    %71 = math.tanh %70 : vector<2x32xf32>
    %cst_30 = arith.constant 1.000000e+00 : f32
    %72 = vector.broadcast %cst_30 : f32 to vector<2x32xf32>
    %73 = arith.subf %72, %66 : vector<2x32xf32>
    %74 = arith.mulf %73, %71 : vector<2x32xf32>
    %75 = arith.mulf %66, %40 : vector<2x32xf32>
    %76 = arith.addf %74, %75 : vector<2x32xf32>
    %c0_31 = arith.constant 0 : index
    %c0_32 = arith.constant 0 : index
    %77 = vector.load %arg1[%c0_31, %c0_32] : memref<2x4xf32, #tpu.memory_space<vmem>>, vector<2x4xf32>
    %c0_33 = arith.constant 0 : index
    %c0_34 = arith.constant 0 : index
    %78 = vector.load %arg11[%c0_33, %c0_34] : memref<4x48xf32, #tpu.memory_space<vmem>>, vector<4x48xf32>
    %cst_35 = arith.constant dense<0.000000e+00> : vector<2x48xf32>
    %79 = tpu.matmul %77, %78, %cst_35 {dimension_numbers = #tpu.dot_dimension_numbers<[1], [0], [0], [1], [0, 0, 1, 1], [], []>} : vector<2x4xf32>, vector<4x48xf32>, vector<2x48xf32> -> vector<2x48xf32>
    %c0_36 = arith.constant 0 : index
    %c0_37 = arith.constant 0 : index
    %80 = vector.load %arg12[%c0_36, %c0_37] : memref<32x48xf32, #tpu.memory_space<vmem>>, vector<32x48xf32>
    %cst_38 = arith.constant dense<0.000000e+00> : vector<2x48xf32>
    %81 = tpu.matmul %76, %80, %cst_38 {dimension_numbers = #tpu.dot_dimension_numbers<[1], [0], [0], [1], [0, 0, 1, 1], [], []>} : vector<2x32xf32>, vector<32x48xf32>, vector<2x48xf32> -> vector<2x48xf32>
    %82 = arith.addf %79, %81 : vector<2x48xf32>
    %83 = vector.extract_strided_slice %82 {offsets = [0, 0], sizes = [2, 16], strides = [1, 1]} : vector<2x48xf32> to vector<2x16xf32>
    %84 = vector.extract_strided_slice %82 {offsets = [0, 16], sizes = [2, 16], strides = [1, 1]} : vector<2x48xf32> to vector<2x16xf32>
    %85 = vector.extract_strided_slice %82 {offsets = [0, 32], sizes = [2, 16], strides = [1, 1]} : vector<2x48xf32> to vector<2x16xf32>
    %86 = arith.addf %83, %84 : vector<2x16xf32>
    %87 = arith.addf %86, %85 : vector<2x16xf32>
    %cst_39 = arith.constant dense<0.000000e+00> : vector<16xf32>
    %88 = vector.multi_reduction <add>, %87, %cst_39 [0] : vector<2x16xf32> to vector<16xf32>
    %89 = vector.shape_cast %88 : vector<16xf32> to vector<1x16xf32>
    %cst_40 = arith.constant 0.166666672 : f32
    %90 = vector.broadcast %cst_40 : f32 to vector<1x16xf32>
    %91 = arith.mulf %89, %90 : vector<1x16xf32>
    %cst_41 = arith.constant 0.000000e+00 : f32
    %92 = vector.broadcast %cst_41 : f32 to vector<1x16xf32>
    %93 = vector.broadcast %91 : vector<1x16xf32> to vector<2x16xf32>
    %94 = arith.subf %83, %93 : vector<2x16xf32>
    %95 = arith.mulf %94, %94 : vector<2x16xf32>
    %cst_42 = arith.constant dense<0.000000e+00> : vector<16xf32>
    %96 = vector.multi_reduction <add>, %95, %cst_42 [0] : vector<2x16xf32> to vector<16xf32>
    %97 = vector.shape_cast %96 : vector<16xf32> to vector<1x16xf32>
    %98 = arith.addf %92, %97 : vector<1x16xf32>
    %99 = vector.broadcast %91 : vector<1x16xf32> to vector<2x16xf32>
    %100 = arith.subf %84, %99 : vector<2x16xf32>
    %101 = arith.mulf %100, %100 : vector<2x16xf32>
    %cst_43 = arith.constant dense<0.000000e+00> : vector<16xf32>
    %102 = vector.multi_reduction <add>, %101, %cst_43 [0] : vector<2x16xf32> to vector<16xf32>
    %103 = vector.shape_cast %102 : vector<16xf32> to vector<1x16xf32>
    %104 = arith.addf %98, %103 : vector<1x16xf32>
    %105 = vector.broadcast %91 : vector<1x16xf32> to vector<2x16xf32>
    %106 = arith.subf %85, %105 : vector<2x16xf32>
    %107 = arith.mulf %106, %106 : vector<2x16xf32>
    %cst_44 = arith.constant dense<0.000000e+00> : vector<16xf32>
    %108 = vector.multi_reduction <add>, %107, %cst_44 [0] : vector<2x16xf32> to vector<16xf32>
    %109 = vector.shape_cast %108 : vector<16xf32> to vector<1x16xf32>
    %110 = arith.addf %104, %109 : vector<1x16xf32>
    %cst_45 = arith.constant 0.166666672 : f32
    %111 = vector.broadcast %cst_45 : f32 to vector<1x16xf32>
    %112 = arith.mulf %110, %111 : vector<1x16xf32>
    %cst_46 = arith.constant 9.99999974E-6 : f32
    %113 = vector.broadcast %cst_46 : f32 to vector<1x16xf32>
    %114 = arith.addf %112, %113 : vector<1x16xf32>
    %115 = math.rsqrt %114 : vector<1x16xf32>
    %116 = vector.broadcast %91 : vector<1x16xf32> to vector<2x16xf32>
    %117 = arith.subf %83, %116 : vector<2x16xf32>
    %118 = vector.broadcast %115 : vector<1x16xf32> to vector<2x16xf32>
    %119 = arith.mulf %117, %118 : vector<2x16xf32>
    %120 = vector.broadcast %91 : vector<1x16xf32> to vector<2x16xf32>
    %121 = arith.subf %84, %120 : vector<2x16xf32>
    %122 = vector.broadcast %115 : vector<1x16xf32> to vector<2x16xf32>
    %123 = arith.mulf %121, %122 : vector<2x16xf32>
    %124 = vector.broadcast %91 : vector<1x16xf32> to vector<2x16xf32>
    %125 = arith.subf %85, %124 : vector<2x16xf32>
    %126 = vector.broadcast %115 : vector<1x16xf32> to vector<2x16xf32>
    %127 = arith.mulf %125, %126 : vector<2x16xf32>
    %128 = tpu.concatenate %119, %123, %127 in 1 : vector<2x16xf32>, vector<2x16xf32>, vector<2x16xf32> -> vector<2x48xf32>
    %c0_47 = arith.constant 0 : index
    %c0_48 = arith.constant 0 : index
    %129 = vector.load %arg13[%c0_47, %c0_48] : memref<48x40xf32, #tpu.memory_space<vmem>>, vector<48x40xf32>
    %cst_49 = arith.constant dense<0.000000e+00> : vector<2x40xf32>
    %130 = tpu.matmul %128, %129, %cst_49 {dimension_numbers = #tpu.dot_dimension_numbers<[1], [0], [0], [1], [0, 0, 1, 1], [], []>} : vector<2x48xf32>, vector<48x40xf32>, vector<2x40xf32> -> vector<2x40xf32>
    %131 = vector.extract_strided_slice %130 {offsets = [0, 0], sizes = [2, 8], strides = [1, 1]} : vector<2x40xf32> to vector<2x8xf32>
    %132 = vector.extract_strided_slice %130 {offsets = [0, 8], sizes = [2, 8], strides = [1, 1]} : vector<2x40xf32> to vector<2x8xf32>
    %133 = vector.extract_strided_slice %130 {offsets = [0, 16], sizes = [2, 8], strides = [1, 1]} : vector<2x40xf32> to vector<2x8xf32>
    %134 = vector.extract_strided_slice %130 {offsets = [0, 24], sizes = [2, 8], strides = [1, 1]} : vector<2x40xf32> to vector<2x8xf32>
    %135 = vector.extract_strided_slice %130 {offsets = [0, 32], sizes = [2, 8], strides = [1, 1]} : vector<2x40xf32> to vector<2x8xf32>
    %136 = arith.addf %131, %132 : vector<2x8xf32>
    %137 = arith.addf %136, %133 : vector<2x8xf32>
    %138 = arith.addf %137, %134 : vector<2x8xf32>
    %139 = arith.addf %138, %135 : vector<2x8xf32>
    %cst_50 = arith.constant dense<0.000000e+00> : vector<8xf32>
    %140 = vector.multi_reduction <add>, %139, %cst_50 [0] : vector<2x8xf32> to vector<8xf32>
    %141 = vector.shape_cast %140 : vector<8xf32> to vector<1x8xf32>
    %cst_51 = arith.constant 1.000000e-01 : f32
    %142 = vector.broadcast %cst_51 : f32 to vector<1x8xf32>
    %143 = arith.mulf %141, %142 : vector<1x8xf32>
    %cst_52 = arith.constant 0.000000e+00 : f32
    %144 = vector.broadcast %cst_52 : f32 to vector<1x8xf32>
    %145 = vector.broadcast %143 : vector<1x8xf32> to vector<2x8xf32>
    %146 = arith.subf %131, %145 : vector<2x8xf32>
    %147 = arith.mulf %146, %146 : vector<2x8xf32>
    %cst_53 = arith.constant dense<0.000000e+00> : vector<8xf32>
    %148 = vector.multi_reduction <add>, %147, %cst_53 [0] : vector<2x8xf32> to vector<8xf32>
    %149 = vector.shape_cast %148 : vector<8xf32> to vector<1x8xf32>
    %150 = arith.addf %144, %149 : vector<1x8xf32>
    %151 = vector.broadcast %143 : vector<1x8xf32> to vector<2x8xf32>
    %152 = arith.subf %132, %151 : vector<2x8xf32>
    %153 = arith.mulf %152, %152 : vector<2x8xf32>
    %cst_54 = arith.constant dense<0.000000e+00> : vector<8xf32>
    %154 = vector.multi_reduction <add>, %153, %cst_54 [0] : vector<2x8xf32> to vector<8xf32>
    %155 = vector.shape_cast %154 : vector<8xf32> to vector<1x8xf32>
    %156 = arith.addf %150, %155 : vector<1x8xf32>
    %157 = vector.broadcast %143 : vector<1x8xf32> to vector<2x8xf32>
    %158 = arith.subf %133, %157 : vector<2x8xf32>
    %159 = arith.mulf %158, %158 : vector<2x8xf32>
    %cst_55 = arith.constant dense<0.000000e+00> : vector<8xf32>
    %160 = vector.multi_reduction <add>, %159, %cst_55 [0] : vector<2x8xf32> to vector<8xf32>
    %161 = vector.shape_cast %160 : vector<8xf32> to vector<1x8xf32>
    %162 = arith.addf %156, %161 : vector<1x8xf32>
    %163 = vector.broadcast %143 : vector<1x8xf32> to vector<2x8xf32>
    %164 = arith.subf %134, %163 : vector<2x8xf32>
    %165 = arith.mulf %164, %164 : vector<2x8xf32>
    %cst_56 = arith.constant dense<0.000000e+00> : vector<8xf32>
    %166 = vector.multi_reduction <add>, %165, %cst_56 [0] : vector<2x8xf32> to vector<8xf32>
    %167 = vector.shape_cast %166 : vector<8xf32> to vector<1x8xf32>
    %168 = arith.addf %162, %167 : vector<1x8xf32>
    %169 = vector.broadcast %143 : vector<1x8xf32> to vector<2x8xf32>
    %170 = arith.subf %135, %169 : vector<2x8xf32>
    %171 = arith.mulf %170, %170 : vector<2x8xf32>
    %cst_57 = arith.constant dense<0.000000e+00> : vector<8xf32>
    %172 = vector.multi_reduction <add>, %171, %cst_57 [0] : vector<2x8xf32> to vector<8xf32>
    %173 = vector.shape_cast %172 : vector<8xf32> to vector<1x8xf32>
    %174 = arith.addf %168, %173 : vector<1x8xf32>
    %cst_58 = arith.constant 1.000000e-01 : f32
    %175 = vector.broadcast %cst_58 : f32 to vector<1x8xf32>
    %176 = arith.mulf %174, %175 : vector<1x8xf32>
    %cst_59 = arith.constant 9.99999974E-6 : f32
    %177 = vector.broadcast %cst_59 : f32 to vector<1x8xf32>
    %178 = arith.addf %176, %177 : vector<1x8xf32>
    %179 = math.rsqrt %178 : vector<1x8xf32>
    %180 = vector.broadcast %143 : vector<1x8xf32> to vector<2x8xf32>
    %181 = arith.subf %131, %180 : vector<2x8xf32>
    %182 = vector.broadcast %179 : vector<1x8xf32> to vector<2x8xf32>
    %183 = arith.mulf %181, %182 : vector<2x8xf32>
    %184 = vector.broadcast %143 : vector<1x8xf32> to vector<2x8xf32>
    %185 = arith.subf %132, %184 : vector<2x8xf32>
    %186 = vector.broadcast %179 : vector<1x8xf32> to vector<2x8xf32>
    %187 = arith.mulf %185, %186 : vector<2x8xf32>
    %188 = vector.broadcast %143 : vector<1x8xf32> to vector<2x8xf32>
    %189 = arith.subf %133, %188 : vector<2x8xf32>
    %190 = vector.broadcast %179 : vector<1x8xf32> to vector<2x8xf32>
    %191 = arith.mulf %189, %190 : vector<2x8xf32>
    %192 = vector.broadcast %143 : vector<1x8xf32> to vector<2x8xf32>
    %193 = arith.subf %134, %192 : vector<2x8xf32>
    %194 = vector.broadcast %179 : vector<1x8xf32> to vector<2x8xf32>
    %195 = arith.mulf %193, %194 : vector<2x8xf32>
    %196 = vector.broadcast %143 : vector<1x8xf32> to vector<2x8xf32>
    %197 = arith.subf %135, %196 : vector<2x8xf32>
    %198 = vector.broadcast %179 : vector<1x8xf32> to vector<2x8xf32>
    %199 = arith.mulf %197, %198 : vector<2x8xf32>
    %200 = tpu.concatenate %183, %187, %191, %195, %199 in 1 : vector<2x8xf32>, vector<2x8xf32>, vector<2x8xf32>, vector<2x8xf32>, vector<2x8xf32> -> vector<2x40xf32>
    %c0_60 = arith.constant 0 : index
    %c0_61 = arith.constant 0 : index
    %201 = vector.load %arg14[%c0_60, %c0_61] : memref<40x28xf32, #tpu.memory_space<vmem>>, vector<40x28xf32>
    %cst_62 = arith.constant dense<0.000000e+00> : vector<2x28xf32>
    %202 = tpu.matmul %200, %201, %cst_62 {dimension_numbers = #tpu.dot_dimension_numbers<[1], [0], [0], [1], [0, 0, 1, 1], [], []>} : vector<2x40xf32>, vector<40x28xf32>, vector<2x28xf32> -> vector<2x28xf32>
    %203 = math.tanh %202 : vector<2x28xf32>
    %c0_63 = arith.constant 0 : index
    %c0_64 = arith.constant 0 : index
    %204 = vector.load %arg15[%c0_63, %c0_64] : memref<2x28xf32, #tpu.memory_space<vmem>>, vector<2x28xf32>
    tpu.vector_store %arg15[%c0_63, %c0_64], %203 {strides = array<i32>} : memref<2x28xf32, #tpu.memory_space<vmem>>, vector<2x28xf32>,
    return
  }
}

</mosaic_0001>

<bundles_post_ra>
// kernel: tpu_custom_call.1
= control target key start
LH: loop header
LB: loop body
LE: loop exit
PB: predicated region body
PF: predicated region fallthrough
CT: control target
= control target key end

     0   :  { %20 = vsyncpa [#allocation3], 0  ;;  %s1341_s0 = inlined_call_operand.hbm [shape: f32[2,4], index: 0, kind: input, shape index: {}]   ;;  %s1342_s1 = inlined_call_operand.hbm [shape: f32[2,4], index: 1, kind: input, shape index: {}]   ;;  %s1343_s2 = inlined_call_operand.hbm [shape: f32[2,2,32], index: 2, kind: input, shape index: {}]   ;;  %s1344_s3 = inlined_call_operand.hbm [shape: f32[4,96], index: 3, kind: input, shape index: {}]   ;;  %s1345_s4 = inlined_call_operand.vmem [shape: f32[1,96], index: 4, kind: input, shape index: {}]   ;;  %s1346_s5 = inlined_call_operand.vmem [shape: f32[32,96], index: 5, kind: input, shape index: {}]   ;;  %s1347_s6 = inlined_call_operand.hbm [shape: f32[1,96], index: 6, kind: input, shape index: {}]   ;;  %s1348_s7 = inlined_call_operand.vmem [shape: f32[32,96], index: 7, kind: input, shape index: {}]   ;;  %s1349_s8 = inlined_call_operand.hbm [shape: f32[1,96], index: 8, kind: input, shape index: {}]   ;;  %s1350_s9 = inlined_call_operand.vmem [shape: f32[32,96], index: 9, kind: input, shape index: {}]   ;;  %s1351_s10 = inlined_call_operand.hbm [shape: f32[1,96], index: 10, kind: input, shape index: {}]   ;;  %s1352_s11 = inlined_call_operand.hbm [shape: f32[4,48], index: 11, kind: input, shape index: {}]   ;;  %s1353_s12 = inlined_call_operand.vmem [shape: f32[32,48], index: 12, kind: input, shape index: {}]   ;;  %s1354_s13 = inlined_call_operand.vmem [shape: f32[48,40], index: 13, kind: input, shape index: {}]   ;;  %s1355_s14 = inlined_call_operand.vmem [shape: f32[40,28], index: 14, kind: input, shape index: {}]   ;;  %s1356_s15 = inlined_call_operand.hbm [shape: f32[2,28], index: 15, kind: output, shape index: {}]  }
   0x1   :  { %21 = vsyncpa [#allocation6], 0 }
   0x2   :  { %22 = vsyncpa [#allocation9], 0 }
   0x3   :  { %23 = vsyncpa [#allocation12], 0 }
   0x4   :  { %24 = vsyncpa [#allocation15], 0  ;;  %s42_s20 = sshll.u32 %s1342_s1, 4  ;;  %s43_s20 = int_to_ptr.hbm [resolvable:$true] %s42_s20 }
   0x5   :  { %25 = vsyncpa [#allocation4], 0  ;;  %s1037_s21 = smov [#allocation5]   ;;  %s66_s25 = sshll.u32 %s1344_s3, 4  ;;  %s67_s25 = int_to_ptr.hbm [resolvable:$true] %s66_s25 }
   0x6   :  { %s44_s22 = sshll.u32 %s1037_s21, 4  ;;  %s1038_s26 = smov [#allocation8]   ;;  %s45_s22 = int_to_ptr.vmem [resolvable:$true] %s44_s22 }
   0x7   :  { %47 = dma.hbm_to_vmem [thread:$0]  %s43_s20, 32, %s45_s22, [#allocation6]  }
   0x8   :  { %s68_s27 = sshll.u32 %s1038_s26, 4  ;;  %s94_s30 = sshll.u32 %s1349_s8, 4  ;;  %s69_s27 = int_to_ptr.vmem [resolvable:$true] %s68_s27  ;;  %s95_s30 = int_to_ptr.hbm [resolvable:$true] %s94_s30 }
   0x9   :  { %71 = dma.hbm_to_vmem [thread:$0]  %s67_s25, 64, %s69_s27, [#allocation9]  }
   0xa   :  { %s31_s17 = sshll.u32 %s1341_s0, 4  ;;  %s1039_s18 = smov [#allocation11]   ;;  %s32_s17 = int_to_ptr.hbm [resolvable:$true] %s31_s17 }
   0xb   :  { %s96_s19 = sshll.u32 %s1039_s18, 4  ;;  %s1040_s3 = smov [#allocation2]   ;;  %s97_s19 = int_to_ptr.vmem [resolvable:$true] %s96_s19 }
   0xc   :  { %99 = dma.hbm_to_vmem [thread:$0]  %s95_s30, 16, %s97_s19, [#allocation12]  }
   0xd   :  { %s33_s20 = sshll.u32 %s1040_s3, 4  ;;  %s52_s23 = sshll.u32 %s1343_s2, 4  ;;  %s34_s20 = int_to_ptr.vmem [resolvable:$true] %s33_s20  ;;  %s53_s23 = int_to_ptr.hbm [resolvable:$true] %s52_s23 }
   0xe   :  { %36 = dma.hbm_to_vmem [thread:$0]  %s32_s17, 32, %s34_s20, [#allocation3]  }
   0xf   :  { %s1041_s8 = smov [#allocation7]   ;;  %s81_s0 = sshll.u32 %s1347_s6, 4  ;;  %s82_s0 = int_to_ptr.hbm [resolvable:$true] %s81_s0 }
  0x10   :  { %s54_s24 = sshll.u32 %s1041_s8, 4  ;;  %s1042_s27 = smov 32   ;;  %s55_s24 = int_to_ptr.vmem [resolvable:$true] %s54_s24 }
  0x11   :  { %s1043_s28 = smov 2   ;;  %s1044_s29 = smov [#allocation10]  }
  0x12   :  { %60 = dma.hbm_to_vmem [thread:$0]  %s53_s23, 64, %s55_s24, [#allocation6], %s1042_s27, %s1042_s27, %s1043_s28  }
  0x13   :  { %s83_s30 = sshll.u32 %s1044_s29, 4  ;;  %s107_s16 = sshll.u32 %s1351_s10, 4  ;;  %s84_s30 = int_to_ptr.vmem [resolvable:$true] %s83_s30  ;;  %s108_s16 = int_to_ptr.hbm [resolvable:$true] %s107_s16 }
  0x14   :  { %86 = dma.hbm_to_vmem [thread:$0]  %s82_s0, 16, %s84_s30, [#allocation9]  }
  0x15   :  { %s118_s19 = sshll.u32 %s1352_s11, 4  ;;  %s1045_s6 = smov [#allocation13]   ;;  %s119_s19 = int_to_ptr.hbm [resolvable:$true] %s118_s19 }
  0x16   :  { %s109_s3 = sshll.u32 %s1045_s6, 4  ;;  %s1046_s20 = smov [#allocation14]   ;;  %s110_s3 = int_to_ptr.vmem [resolvable:$true] %s109_s3 }
  0x17   :  { %112 = dma.hbm_to_vmem [thread:$0]  %s108_s16, 16, %s110_s3, [#allocation12]  }
  0x18   :  { %s120_s21 = sshll.u32 %s1046_s20, 4  ;;  %s121_s21 = int_to_ptr.vmem [resolvable:$true] %s120_s21 }
  0x19   :  { %123 = dma.hbm_to_vmem [thread:$0]  %s119_s19, 64, %s121_s21, [#allocation15]  }
  0x1a   :  { %1025 = dma.done.wait [#allocation3], 32  }
  0x1b   :  { %1026 = vsyncadd [#allocation3], 4294967264 }
  0x1c   :  { %1027 = dma.done.wait [#allocation6], 96  }
  0x1d   :  { %1028 = vsyncadd [#allocation6], 4294967200 }
  0x1e   :  { %1029 = dma.done.wait [#allocation9], 80  }
  0x1f   :  { %1030 = vsyncadd [#allocation9], 4294967216 }
  0x20   :  { %1031 = dma.done.wait [#allocation12], 32  }
  0x21   :  { %1032 = vsyncadd [#allocation12], 4294967264 }
  0x22   :  { %1033 = dma.done.wait [#allocation15], 64  }
  0x23   :  { %1034 = vsyncadd [#allocation15], 4294967232  ;;  %vm173_vm0 = vcmask 1043456   ;;  %vm169_vm1 = vcmask 31744   ;;  %v164_v0 = vld [vmem:[#allocation8] sm:$0xf] }
  0x24   :  { %v200_v1 = vld [vmem:[%s1346_s5 + $0x18] sm:$0xff]  ;;  %v162_v2 = vld [vmem:[#allocation2] sm:$0x3]  ;;  %756 = vmatpush.msk.msra.mxu2 %vm173_vm0, %v164_v0  ;;  %v199_v3 = vld [vmem:[%s1346_s5 + $0x10] sm:$0xff]  ;;  %vm205_vm2 = vcmask 261120   ;;  %s1047_s0 = smov 64  }
  0x25   :  { %221 = vmatpush.msra.mxu1 %v200_v1  ;;  %757 = vmatmul.msk.f32.vlgmr.msra.gmra.mxu2 %vm169_vm1, %v162_v2  ;;  %v198_v4 = vld [vmem:[%s1346_s5 + $0x8] sm:$0xff]  ;;  %v197_v5 = vld [vmem:[%s1346_s5] sm:$0xff]  ;;  %v309_v32 = vld [vmem:[%s1350_s9 + $0x18] sm:$0xff]  ;;  %vm445_vm11 = vcmask 123904   ;;  %s1050_s29 = smov 16   ;;  %vm488_vm12 = vcmask 386304  }
  0x26   :  { %v163_v6 = vld [vmem:[#allocation7] sm:$0x3]  ;;  %v788_v7 = vld [vmem:[#allocation10] ss:$0 sm:$0xff]  ;;  %v787_v10 = vld [vmem:[%s1345_s4] ss:$0 sm:$0xff]  ;;  %329 = vmatpush.msra.mxu3 %v309_v32 }
  0x27   :  { %222 = vmatpush.msra.mxu1 %v199_v3  ;;  %s1048_s4 = smov 96   ;;  %v308_v33 = vld [vmem:[%s1350_s9 + $0x10] sm:$0xff]  ;;  %v276_v34 = vld [vmem:[%s1348_s7 + $0x18] sm:$0xff]  ;;  %v307_v35 = vld [vmem:[%s1350_s9 + $0x8] sm:$0xff]  ;;  %vm470_vm13 = vcmask 255104   ;;  %s1051_s10 = smov 104  }
  0x28   :  { %298 = vmatpush.msra.mxu0 %v276_v34  ;;  %v275_v36 = vld [vmem:[%s1348_s7 + $0x10] sm:$0xff]  ;;  %330 = vmatpush.msra.mxu3 %v308_v33  ;;  %v274_v37 = vld [vmem:[%s1348_s7 + $0x8] sm:$0xff]  ;;  %v306_v38 = vld [vmem:[%s1350_s9] sm:$0xff]  ;;  %s1053_s11 = smov 24   ;;  %s1054_s22 = smov 8  }
  0x29   :  { %223 = vmatpush.msra.mxu1 %v198_v4  ;;  %v272_v39 = vld [vmem:[#allocation7 + $0x2] sm:$0x3]  ;;  %v789_v48 = vld [vmem:[#allocation13] ss:$0 sm:$0xff]  ;;  %v790_v51 = vld [vmem:[#allocation11] ss:$0 sm:$0xff] }
  0x2a   :  { %299 = vmatpush.msra.mxu0 %v275_v36  ;;  %331 = vmatpush.msra.mxu3 %v307_v35  ;;  %v273_v40 = vld [vmem:[%s1348_s7] sm:$0xff]  ;;  %s742_s5 = sshll.u32 %s1356_s15, 4  ;;  %s743_s5 = int_to_ptr.hbm [resolvable:$true] %s742_s5 }
  0x2b   :  { %224 = vmatpush.msra.mxu1 %v197_v5 }
  0x2c   :  { %758 = vmatmul.msk.f32.vlgmr.msra.gmra.mxu1 %vm205_vm2, %v163_v6  ;;  %300 = vmatpush.msra.mxu0 %v274_v37 }
  0x2d   :  { %332 = vmatpush.msra.mxu3 %v306_v38 }
  0x2e   :  { %761 = vmatmul.msk.f32.vlgmr.msra.gmra.mxu3 %vm205_vm2, %v272_v39  ;;  %301 = vmatpush.msra.mxu0 %v273_v40 }
  0xa8   :  { %v194_v11 = vpop.f32.mrf.mxu2 }
  0xa9   :  { %v226_v8 = vpop.f32.mrf.mxu1  ;;  %v195_v12 = vadd.f32 %v787_v10, %v194_v11  ;;  %v380_v10 = vld [vmem:[#allocation14] sm:$0xf] }
  0xaa   :  { %v227_v9 = vadd.f32 %v788_v7, %v226_v8  ;;  %v383_v11 = vld [vmem:[%s1353_s12 + $0x10] sm:$0xff]  ;;  %764 = vmatpush.msk.msrb.mxu1 %vm173_vm0, %v380_v10 }
  0xac   :  { %250 = vrot.lane.b32.xlu0 %v227_v9, %s1047_s0  ;;  %v229_v13 = vadd.f32 %v227_v9, %v195_v12  ;;  %v384_v9 = vld [vmem:[%s1353_s12 + $0x18] sm:$0xff] }
  0xad   :  { %402 = vmatpush.msrb.mxu0 %v384_v9 }
  0xae   :  { %v759_v14 = vmul.f32 -1.442695, %v229_v13  ;;  %v381_v13 = vld [vmem:[%s1353_s12] sm:$0xff] }
  0xaf   :  { %403 = vmatpush.msrb.mxu0 %v383_v11 }
  0xb0   :  { %791 = vpow2.f32 %v759_v14 }
  0xb1   :  { %v334_v49 = vpop.f32.mrf.mxu3 }
  0xb2   :  { %v335_v50 = vadd.f32 %v789_v48, %v334_v49 }
  0xb6   :  { %v792_v15 = vpop.eup %791 }
  0xb7   :  { %v233_v16 = vadd.f32 1.0, %v792_v15 }
  0xb9   :  { %793 = vrcp.f32 %v233_v16  ;;  %v245_v22 = vand.u32 2147483648, %v233_v16  ;;  %vm239_vm4 = vweird.f32 %v233_v16  ;;  %v243_v23 = vand.u32 2147483647, %v233_v16 }
  0xbb   :  { %v246_v25 = vor.u32 1.1754944e-38, %v245_v22  ;;  %vm244_vm6 = vcmp.eq.f32.partialorder %v243_v23, 8.507059e+37 }
  0xbf   :  { %v794_v17 = vpop.eup %793 }
  0xc0   :  { %v235_v18 = vmul.f32 %v794_v17, %v233_v16  ;;  %vm240_vm3 = vweird.f32 %v794_v17 }
  0xc1   :  { %vm241_vm5 = vmor %vm239_vm4, %vm240_vm3  ;;  %vm533_vm3 = vcmask 392192   ;;  %vm574_vm4 = vcmask 58368  }
  0xc2   :  { %v236_v19 = vsub.f32 1.0, %v235_v18 }
  0xc4   :  { %v237_v20 = vmul.f32 %v794_v17, %v236_v19 }
  0xc6   :  { %v238_v21 = vadd.f32 %v794_v17, %v237_v20  ;;  %v379_v20 = vld [vmem:[#allocation5] sm:$0x3] }
  0xc7   :  { %765 = vmatmul.msk.f32.vlgmr.msrb.gmra.mxu1 %vm169_vm1, %v379_v20  ;;  %v528_v20 = vld [vmem:[%s1354_s13 + $0x8] sm:$0xff]  ;;  %vm524_vm1 = vcmask 130048  }
  0xc8   :  { %v242_v24 = vsel %vm241_vm5, %v794_v17, %v238_v21  ;;  %vm617_vm5 = vcmask 189568  }
  0xc9   :  { %v247_v27 = vsel %vm244_vm6, %v246_v25, %v242_v24  ;;  %vm635_vm6 = vcmask 255168  }
  0xca   :  { %v260_v42 = vsub.f32 1.0, %v247_v27 }
 0x11e   :  { %v251_v26 = vpop.permute.xlu0 %250 }
 0x11f   :  { %v253_v28 = vmul.f32 %v251_v26, %v247_v27 }
 0x121   :  { %255 = vrot.lane.b32.xlu0 %v253_v28, %s1047_s0 }
 0x144   :  { %v433_v22 = vpop.f32.mrf.mxu1 }
 0x193   :  { %v256_v29 = vpop.permute.xlu0 %255 }
 0x194   :  { %v258_v30 = vadd.f32 %v256_v29, %v195_v12  ;;  %v382_v12 = vld [vmem:[%s1353_s12 + $0x8] sm:$0xff]  ;;  %s1049_s12 = smov 112  }
 0x195   :  { %404 = vmatpush.msrb.mxu0 %v382_v12 }
 0x196   :  { %795 = vtanh.f32 %v258_v30 }
 0x197   :  { %405 = vmatpush.msrb.mxu0 %v381_v13 }
 0x19c   :  { %v796_v31 = vpop.eup %795 }
 0x19d   :  { %262 = vrot.lane.b32.xlu1 %v796_v31, %s1048_s4 }
 0x1a5   :  { %266 = vrot.lane.b32.xlu1 %v163_v6, %s1042_s27 }
 0x20f   :  { %v263_v41 = vpop.permute.xlu1 %262 }
 0x210   :  { %v265_v44 = vmul.f32 %v263_v41, %v260_v42 }
 0x217   :  { %v267_v43 = vpop.permute.xlu1 %266 }
 0x218   :  { %v269_v45 = vmul.f32 %v267_v43, %v247_v27 }
 0x21a   :  { %v270_v46 = vadd.f32 %v269_v45, %v265_v44 }
 0x21c   :  { %282 = vrot.lane.b32.xlu2 %v270_v46, %s1048_s4 }
 0x224   :  { %358 = vrot.lane.b32.xlu2 %v335_v50, %s1047_s0 }
 0x22c   :  { %374 = vrot.lane.b32.xlu2 %v272_v39, %s1042_s27 }
 0x276   :  { %v283_v47 = vpop.permute.xlu2 %282 }
 0x277   :  { %760 = vmatmul.msk.f32.vlgmr.msra.gmra.mxu0 %vm205_vm2, %v283_v47 }
 0x27e   :  { %v359_v4 = vpop.permute.xlu2 %358 }
 0x286   :  { %v375_v14 = vpop.permute.xlu2 %374 }
 0x2f4   :  { %v303_v52 = vpop.f32.mrf.mxu0 }
 0x2f5   :  { %v304_v53 = vadd.f32 %v790_v51, %v303_v52 }
 0x2f7   :  { %v337_v54 = vadd.f32 %v335_v50, %v304_v53 }
 0x2f9   :  { %v762_v55 = vmul.f32 -1.442695, %v337_v54 }
 0x2fb   :  { %797 = vpow2.f32 %v762_v55 }
 0x301   :  { %v798_v56 = vpop.eup %797 }
 0x302   :  { %v341_v57 = vadd.f32 1.0, %v798_v56 }
 0x304   :  { %799 = vrcp.f32 %v341_v57  ;;  %v353_v61 = vand.u32 2147483648, %v341_v57  ;;  %v351_v63 = vand.u32 2147483647, %v341_v57  ;;  %vm347_vm8 = vweird.f32 %v341_v57 }
 0x306   :  { %v354_v1 = vor.u32 1.1754944e-38, %v353_v61  ;;  %vm352_vm10 = vcmp.eq.f32.partialorder %v351_v63, 8.507059e+37 }
 0x30a   :  { %v800_v58 = vpop.eup %799 }
 0x30b   :  { %v343_v59 = vmul.f32 %v800_v58, %v341_v57  ;;  %vm348_vm7 = vweird.f32 %v800_v58 }
 0x30c   :  { %vm349_vm9 = vmor %vm347_vm8, %vm348_vm7  ;;  %vm599_vm7 = vcmask 123968   ;;  %vm653_vm8 = vcmask 320768  }
 0x30d   :  { %v344_v60 = vsub.f32 1.0, %v343_v59 }
 0x30f   :  { %v345_v62 = vmul.f32 %v800_v58, %v344_v60 }
 0x311   :  { %v346_v0 = vadd.f32 %v800_v58, %v345_v62 }
 0x313   :  { %v350_v2 = vsel %vm349_vm9, %v800_v58, %v346_v0 }
 0x314   :  { %v355_v3 = vsel %vm352_vm10, %v354_v1, %v350_v2 }
 0x315   :  { %v361_v5 = vmul.f32 %v359_v4, %v355_v3  ;;  %v368_v15 = vsub.f32 1.0, %v355_v3  ;;  %v377_v17 = vmul.f32 %v375_v14, %v355_v3 }
 0x317   :  { %363 = vrot.lane.b32.xlu0 %v361_v5, %s1047_s0 }
 0x389   :  { %v364_v6 = vpop.permute.xlu0 %363 }
 0x38a   :  { %v366_v7 = vadd.f32 %v364_v6, %v304_v53 }
 0x38c   :  { %801 = vtanh.f32 %v366_v7 }
 0x392   :  { %v802_v8 = vpop.eup %801 }
 0x393   :  { %370 = vrot.lane.b32.xlu1 %v802_v8, %s1048_s4 }
 0x405   :  { %v371_v16 = vpop.permute.xlu1 %370 }
 0x406   :  { %v373_v18 = vmul.f32 %v371_v16, %v368_v15  ;;  %v532_v16 = vld [vmem:[%s1354_s13 + $0x28] sm:$0xff] }
 0x407   :  { %547 = vmatpush.msrb.mxu2 %v532_v16 }
 0x408   :  { %v378_v19 = vadd.f32 %v377_v17, %v373_v18  ;;  %v531_v17 = vld [vmem:[%s1354_s13 + $0x20] sm:$0xff]  ;;  %v530_v18 = vld [vmem:[%s1354_s13 + $0x18] sm:$0xff] }
 0x409   :  { %548 = vmatpush.msrb.mxu2 %v531_v17 }
 0x40a   :  { %386 = vrot.lane.b32.xlu0 %v378_v19, %s1048_s4  ;;  %v529_v19 = vld [vmem:[%s1354_s13 + $0x10] sm:$0xff] }
 0x40b   :  { %549 = vmatpush.msrb.mxu2 %v530_v18 }
 0x40d   :  { %550 = vmatpush.msrb.mxu2 %v529_v19 }
 0x40f   :  { %551 = vmatpush.msrb.mxu2 %v528_v20 }
 0x47c   :  { %v387_v21 = vpop.permute.xlu0 %386 }
 0x47d   :  { %763 = vmatmul.msk.f32.vlgmr.msrb.gmra.mxu0 %vm205_vm2, %v387_v21  ;;  %v527_v21 = vld [vmem:[%s1354_s13] sm:$0xff]  ;;  %s1052_s13 = smov 120  }
 0x47e   :  { %552 = vmatpush.msrb.mxu2 %v527_v21 }
 0x4fa   :  { %v407_v23 = vpop.f32.mrf.mxu0 }
 0x4fb   :  { %v434_v24 = vadd.f32 %v433_v22, %v407_v23 }
 0x4fd   :  { %441 = vrot.lane.b32.xlu2 %v434_v24, %s1048_s4  ;;  %437 = vrot.lane.b32.xlu1 %v434_v24, %s1049_s12 }
 0x557   :  { %v442_v27 = vpop.permute.xlu2 %441 }
 0x56f   :  { %v438_v25 = vpop.permute.xlu1 %437 }
 0x570   :  { %v440_v26 = vadd.f32 %v438_v25, %v434_v24 }
 0x572   :  { %v444_v28 = vadd.f32 %v442_v27, %v440_v26 }
 0x574   :  { %v446_v29 = vsel %vm445_vm11, %v444_v28, 0.0 }
 0x575   :  { %v447_v30 = vrot.slane %v446_v29, 4 }
 0x577   :  { %v448_v31 = vadd.f32 %v447_v30, %v446_v29 }
 0x579   :  { %v449_v32 = vrot.slane %v448_v31, 2 }
 0x57b   :  { %v450_v33 = vadd.f32 %v449_v32, %v448_v31 }
 0x57d   :  { %v451_v34 = vrot.slane %v450_v33, 1 }
 0x57f   :  { %v452_v35 = vadd.f32 %v451_v34, %v450_v33 }
 0x581   :  { %v453_v36 = vmul.f32 0.16666667, %v452_v35 }
 0x583   :  { %483 = vrot.lane.b32.xlu1 %v453_v36, %s1042_s27  ;;  %465 = vrot.lane.b32.xlu0 %v453_v36, %s1050_s29  ;;  %v454_v57 = vsub.f32 %v434_v24, %v453_v36 }
 0x585   :  { %v455_v58 = vmul.f32 %v454_v57, %v454_v57 }
 0x587   :  { %v456_v59 = vsel %vm445_vm11, %v455_v58, 0.0 }
 0x588   :  { %v457_v60 = vrot.slane %v456_v59, 4 }
 0x58a   :  { %v458_v61 = vadd.f32 %v457_v60, %v456_v59 }
 0x58c   :  { %v459_v62 = vrot.slane %v458_v61, 2 }
 0x58e   :  { %v460_v63 = vadd.f32 %v459_v62, %v458_v61 }
 0x590   :  { %v461_v0 = vrot.slane %v460_v63, 1 }
 0x592   :  { %v462_v2 = vadd.f32 %v461_v0, %v460_v63 }
 0x5f5   :  { %v484_v37 = vpop.permute.xlu1 %483  ;;  %v466_v38 = vpop.permute.xlu0 %465 }
 0x5f6   :  { %v1236_v39 = vsub.f32 %v434_v24, %v484_v37  ;;  %v1238_v40 = vsub.f32 %v434_v24, %v466_v38 }
 0x5f8   :  { %v487_v41 = vmul.f32 %v1236_v39, %v1236_v39  ;;  %v469_v42 = vmul.f32 %v1238_v40, %v1238_v40 }
 0x5fa   :  { %v489_v43 = vsel %vm488_vm12, %v487_v41, 0.0  ;;  %v471_v44 = vsel %vm470_vm13, %v469_v42, 0.0  ;;  %vm697_vm12 = vcmask 64512   ;;  %vm700_vm13 = vcmask 195584  }
 0x5fb   :  { %v490_v45 = vrot.slane %v489_v43, 4  ;;  %v472_v46 = vrot.slane %v471_v44, 4 }
 0x5fd   :  { %v491_v47 = vadd.f32 %v490_v45, %v489_v43  ;;  %v473_v48 = vadd.f32 %v472_v46, %v471_v44 }
 0x5ff   :  { %v492_v49 = vrot.slane %v491_v47, 2  ;;  %v474_v50 = vrot.slane %v473_v48, 2 }
 0x601   :  { %v493_v51 = vadd.f32 %v492_v49, %v491_v47  ;;  %v475_v52 = vadd.f32 %v474_v50, %v473_v48 }
 0x603   :  { %v494_v53 = vrot.slane %v493_v51, 1  ;;  %v476_v54 = vrot.slane %v475_v52, 1 }
 0x605   :  { %v495_v55 = vadd.f32 %v494_v53, %v493_v51  ;;  %v477_v56 = vadd.f32 %v476_v54, %v475_v52 }
 0x607   :  { %497 = vrot.lane.b32.xlu0 %v495_v55, %s1048_s4  ;;  %479 = vrot.lane.b32.xlu2 %v477_v56, %s1049_s12 }
 0x661   :  { %v480_v1 = vpop.permute.xlu2 %479 }
 0x662   :  { %v482_v3 = vadd.f32 %v480_v1, %v462_v2 }
 0x679   :  { %v498_v4 = vpop.permute.xlu0 %497 }
 0x67a   :  { %v500_v5 = vadd.f32 %v498_v4, %v482_v3 }
 0x67c   :  { %v501_v6 = vmul.f32 0.16666667, %v500_v5 }
 0x67e   :  { %v502_v7 = vadd.f32 1e-05, %v501_v6 }
 0x680   :  { %803 = vrsqrt.f32 %v502_v7  ;;  %vm509_vm15 = vweird.f32 %v502_v7 }
 0x686   :  { %v804_v8 = vpop.eup %803 }
 0x687   :  { %v504_v9 = vmul.f32 %v804_v8, %v502_v7  ;;  %vm510_vm14 = vweird.f32 %v804_v8 }
 0x688   :  { %vm511_vm0 = vmor %vm509_vm15, %vm510_vm14  ;;  %vm708_vm14 = vcmask 326656   ;;  %vm733_vm15 = vcmask 222208  }
 0x689   :  { %v505_v10 = vmul.f32 %v804_v8, %v504_v9 }
 0x68b   :  { %v506_v11 = vmul.f32 0.5, %v505_v10 }
 0x68d   :  { %v507_v12 = vsub.f32 1.5, %v506_v11 }
 0x68f   :  { %v508_v13 = vmul.f32 %v804_v8, %v507_v12 }
 0x691   :  { %v512_v14 = vsel %vm511_vm0, %v804_v8, %v508_v13 }
 0x692   :  { %v513_v15 = vperm.slane %v512_v14, 0 }
 0x694   :  { %520 = vrot.lane.b32.xlu2 %v513_v15, %s1042_s27  ;;  %516 = vrot.lane.b32.xlu1 %v513_v15, %s1050_s29  ;;  %v514_v24 = vmul.f32 %v513_v15, %v454_v57 }
 0x6ee   :  { %v521_v22 = vpop.permute.xlu2 %520 }
 0x6ef   :  { %v523_v26 = vmul.f32 %v521_v22, %v1236_v39 }
 0x706   :  { %v517_v23 = vpop.permute.xlu1 %516 }
 0x707   :  { %v519_v25 = vmul.f32 %v517_v23, %v1238_v40 }
 0x709   :  { %v525_v27 = vsel %vm524_vm1, %v514_v24, %v519_v25 }
 0x70a   :  { %v526_v28 = vsel %vm205_vm2, %v525_v27, %v523_v26 }
 0x70b   :  { %766 = vmatmul.msk.f32.vlgmr.msrb.gmra.mxu2 %vm533_vm3, %v526_v28 }
 0x78e   :  { %v1271_v29 = vpop.f32.mrf.mxu2 }
 0x78f   :  { %566 = vrot.lane.b32.xlu2 %v1271_v29, %s1051_s10  ;;  %562 = vrot.lane.b32.xlu1 %v1271_v29, %s1049_s12 }
 0x790   :  { %558 = vrot.lane.b32.xlu0 %v1271_v29, %s1052_s13 }
 0x798   :  { %570 = vrot.lane.b32.xlu0 %v1271_v29, %s1048_s4 }
 0x7e9   :  { %v567_v34 = vpop.permute.xlu2 %566 }
 0x801   :  { %v563_v32 = vpop.permute.xlu1 %562 }
 0x802   :  { %v559_v30 = vpop.permute.xlu0 %558 }
 0x803   :  { %v561_v31 = vadd.f32 %v559_v30, %v1271_v29 }
 0x805   :  { %v565_v33 = vadd.f32 %v563_v32, %v561_v31 }
 0x807   :  { %v569_v35 = vadd.f32 %v567_v34, %v565_v33 }
 0x80a   :  { %v571_v36 = vpop.permute.xlu0 %570 }
 0x80b   :  { %v573_v37 = vadd.f32 %v571_v36, %v569_v35 }
 0x80d   :  { %v575_v38 = vsel %vm574_vm4, %v573_v37, 0.0 }
 0x80e   :  { %v576_v39 = vrot.slane %v575_v38, 4 }
 0x810   :  { %v577_v40 = vadd.f32 %v576_v39, %v575_v38 }
 0x812   :  { %v578_v41 = vrot.slane %v577_v40, 2 }
 0x814   :  { %v579_v42 = vadd.f32 %v578_v41, %v577_v40 }
 0x816   :  { %v580_v43 = vrot.slane %v579_v42, 1 }
 0x818   :  { %v581_v44 = vadd.f32 %v580_v43, %v579_v42 }
 0x81a   :  { %v582_v45 = vmul.f32 0.1, %v581_v44 }
 0x81c   :  { %630 = vrot.lane.b32.xlu0 %v582_v45, %s1053_s11  ;;  %612 = vrot.lane.b32.xlu2 %v582_v45, %s1050_s29  ;;  %v583_v22 = vsub.f32 %v1271_v29, %v582_v45 }
 0x81d   :  { %594 = vrot.lane.b32.xlu1 %v582_v45, %s1054_s22 }
 0x81e   :  { %v584_v23 = vmul.f32 %v583_v22, %v583_v22 }
 0x820   :  { %v585_v24 = vsel %vm574_vm4, %v584_v23, 0.0 }
 0x821   :  { %v586_v25 = vrot.slane %v585_v24, 4 }
 0x823   :  { %v587_v26 = vadd.f32 %v586_v25, %v585_v24 }
 0x825   :  { %648 = vrot.lane.b32.xlu1 %v582_v45, %s1042_s27  ;;  %v588_v27 = vrot.slane %v587_v26, 2 }
 0x827   :  { %v589_v28 = vadd.f32 %v588_v27, %v587_v26 }
 0x829   :  { %v590_v30 = vrot.slane %v589_v28, 1 }
 0x82b   :  { %v591_v32 = vadd.f32 %v590_v30, %v589_v28 }
 0x876   :  { %v613_v46 = vpop.permute.xlu2 %612 }
 0x877   :  { %v1288_v47 = vsub.f32 %v1271_v29, %v613_v46 }
 0x879   :  { %v616_v48 = vmul.f32 %v1288_v47, %v1288_v47 }
 0x87b   :  { %v618_v49 = vsel %vm617_vm5, %v616_v48, 0.0 }
 0x87c   :  { %v619_v50 = vrot.slane %v618_v49, 4 }
 0x87e   :  { %v620_v51 = vadd.f32 %v619_v50, %v618_v49  ;;  %v707_v50 = vld [vmem:[%s1355_s14 + $0x20] sm:$0xff] }
 0x87f   :  { %723 = vmatpush.msrb.mxu3 %v707_v50 }
 0x880   :  { %v621_v52 = vrot.slane %v620_v51, 2 }
 0x882   :  { %v622_v53 = vadd.f32 %v621_v52, %v620_v51  ;;  %v706_v51 = vld [vmem:[%s1355_s14 + $0x18] sm:$0xff]  ;;  %v705_v52 = vld [vmem:[%s1355_s14 + $0x10] sm:$0xff] }
 0x883   :  { %724 = vmatpush.msrb.mxu3 %v706_v51 }
 0x884   :  { %v623_v54 = vrot.slane %v622_v53, 1 }
 0x885   :  { %725 = vmatpush.msrb.mxu3 %v705_v52 }
 0x886   :  { %v624_v55 = vadd.f32 %v623_v54, %v622_v53  ;;  %v704_v53 = vld [vmem:[%s1355_s14 + $0x8] sm:$0xff]  ;;  %v703_v54 = vld [vmem:[%s1355_s14] sm:$0xff]  ;;  %s1055_s14 = smov [#allocation16]  }
 0x887   :  { %726 = vmatpush.msrb.mxu3 %v704_v53  ;;  %s740_s28 = sshll.u32 %s1055_s14, 4  ;;  %s741_s28 = int_to_ptr.vmem [resolvable:$true] %s740_s28 }
 0x888   :  { %626 = vrot.lane.b32.xlu0 %v624_v55, %s1049_s12 }
 0x889   :  { %727 = vmatpush.msrb.mxu3 %v703_v54 }
 0x88e   :  { %v631_v56 = vpop.permute.xlu0 %630 }
 0x88f   :  { %v1294_v57 = vsub.f32 %v1271_v29, %v631_v56  ;;  %v595_v58 = vpop.permute.xlu1 %594 }
 0x890   :  { %v1297_v59 = vsub.f32 %v1271_v29, %v595_v58 }
 0x891   :  { %v634_v60 = vmul.f32 %v1294_v57, %v1294_v57 }
 0x892   :  { %v598_v61 = vmul.f32 %v1297_v59, %v1297_v59 }
 0x893   :  { %v636_v62 = vsel %vm635_vm6, %v634_v60, 0.0 }
 0x894   :  { %v637_v63 = vrot.slane %v636_v62, 4  ;;  %v600_v0 = vsel %vm599_vm7, %v598_v61, 0.0 }
 0x895   :  { %v601_v1 = vrot.slane %v600_v0, 4 }
 0x896   :  { %v638_v2 = vadd.f32 %v637_v63, %v636_v62 }
 0x897   :  { %v602_v3 = vadd.f32 %v601_v1, %v600_v0  ;;  %v649_v4 = vpop.permute.xlu1 %648 }
 0x898   :  { %v639_v5 = vrot.slane %v638_v2, 2  ;;  %v1304_v6 = vsub.f32 %v1271_v29, %v649_v4 }
 0x899   :  { %v603_v7 = vrot.slane %v602_v3, 2 }
 0x89a   :  { %v652_v8 = vmul.f32 %v1304_v6, %v1304_v6  ;;  %v640_v9 = vadd.f32 %v639_v5, %v638_v2 }
 0x89b   :  { %v604_v10 = vadd.f32 %v603_v7, %v602_v3 }
 0x89c   :  { %v654_v11 = vsel %vm653_vm8, %v652_v8, 0.0  ;;  %v641_v12 = vrot.slane %v640_v9, 1 }
 0x89d   :  { %v655_v13 = vrot.slane %v654_v11, 4  ;;  %v605_v14 = vrot.slane %v604_v10, 1 }
 0x89e   :  { %v642_v15 = vadd.f32 %v641_v12, %v640_v9 }
 0x89f   :  { %v656_v16 = vadd.f32 %v655_v13, %v654_v11  ;;  %v606_v17 = vadd.f32 %v605_v14, %v604_v10 }
 0x8a0   :  { %644 = vrot.lane.b32.xlu1 %v642_v15, %s1051_s10 }
 0x8a1   :  { %v657_v18 = vrot.slane %v656_v16, 2  ;;  %608 = vrot.lane.b32.xlu2 %v606_v17, %s1052_s13 }
 0x8a3   :  { %v658_v19 = vadd.f32 %v657_v18, %v656_v16 }
 0x8a5   :  { %v659_v20 = vrot.slane %v658_v19, 1 }
 0x8a7   :  { %v660_v21 = vadd.f32 %v659_v20, %v658_v19 }
 0x8a9   :  { %662 = vrot.lane.b32.xlu2 %v660_v21, %s1048_s4 }
 0x8fa   :  { %v627_v34 = vpop.permute.xlu0 %626 }
 0x8fb   :  { %v609_v31 = vpop.permute.xlu2 %608 }
 0x8fc   :  { %v611_v33 = vadd.f32 %v609_v31, %v591_v32 }
 0x8fe   :  { %v629_v35 = vadd.f32 %v627_v34, %v611_v33 }
 0x903   :  { %v663_v38 = vpop.permute.xlu2 %662 }
 0x912   :  { %v645_v36 = vpop.permute.xlu1 %644 }
 0x913   :  { %v647_v37 = vadd.f32 %v645_v36, %v629_v35 }
 0x915   :  { %v665_v39 = vadd.f32 %v663_v38, %v647_v37 }
 0x917   :  { %v666_v40 = vmul.f32 0.1, %v665_v39 }
 0x919   :  { %v667_v41 = vadd.f32 1e-05, %v666_v40 }
 0x91b   :  { %805 = vrsqrt.f32 %v667_v41  ;;  %vm674_vm10 = vweird.f32 %v667_v41 }
 0x921   :  { %v806_v29 = vpop.eup %805 }
 0x922   :  { %v669_v42 = vmul.f32 %v806_v29, %v667_v41  ;;  %vm675_vm9 = vweird.f32 %v806_v29 }
 0x923   :  { %vm676_vm11 = vmor %vm674_vm10, %vm675_vm9 }
 0x924   :  { %v670_v43 = vmul.f32 %v806_v29, %v669_v42 }
 0x926   :  { %v671_v44 = vmul.f32 0.5, %v670_v43 }
 0x928   :  { %v672_v45 = vsub.f32 1.5, %v671_v44 }
 0x92a   :  { %v673_v46 = vmul.f32 %v806_v29, %v672_v45 }
 0x92c   :  { %v677_v48 = vsel %vm676_vm11, %v806_v29, %v673_v46 }
 0x92d   :  { %v678_v49 = vperm.slane %v677_v48, 0 }
 0x92f   :  { %689 = vrot.lane.b32.xlu2 %v678_v49, %s1053_s11  ;;  %685 = vrot.lane.b32.xlu1 %v678_v49, %s1050_s29  ;;  %v679_v60 = vmul.f32 %v678_v49, %v583_v22 }
 0x930   :  { %681 = vrot.lane.b32.xlu0 %v678_v49, %s1054_s22 }
 0x938   :  { %693 = vrot.lane.b32.xlu0 %v678_v49, %s1042_s27 }
 0x989   :  { %v690_v63 = vpop.permute.xlu2 %689 }
 0x98a   :  { %v692_v1 = vmul.f32 %v690_v63, %v1294_v57 }
 0x9a1   :  { %v686_v55 = vpop.permute.xlu1 %685 }
 0x9a2   :  { %v682_v56 = vpop.permute.xlu0 %681  ;;  %v688_v61 = vmul.f32 %v686_v55, %v1288_v47 }
 0x9a3   :  { %v684_v58 = vmul.f32 %v682_v56, %v1297_v59 }
 0x9a5   :  { %v698_v62 = vsel %vm697_vm12, %v679_v60, %v684_v58 }
 0x9a6   :  { %v699_v0 = vsel %vm524_vm1, %v698_v62, %v688_v61 }
 0x9a7   :  { %v701_v4 = vsel %vm700_vm13, %v699_v0, %v692_v1 }
 0x9aa   :  { %v694_v2 = vpop.permute.xlu0 %693 }
 0x9ab   :  { %v696_v3 = vmul.f32 %v694_v2, %v1304_v6 }
 0x9ad   :  { %v702_v5 = vsel %vm205_vm2, %v701_v4, %v696_v3 }
 0x9ae   :  { %767 = vmatmul.msk.f32.vlgmr.msrb.gmra.mxu3 %vm708_vm14, %v702_v5 }
 0xa31   :  { %v729_v7 = vpop.f32.mrf.mxu3 }
 0xa32   :  { %807 = vtanh.f32 %v729_v7 }
 0xa38   :  { %v808_v47 = vpop.eup %807 }
 0xa39   :  { %734 = vst.msk [vmem:[#allocation16] sm:$0x3] %vm733_vm15, %v808_v47 }
 0xa3a   :  { %745 = dma.vmem_to_hbm [thread:$0]  %s741_s28, 32, %s743_s5, [#allocation4]  }
 0xa3b   :  { %1035 = dma.done.wait [#allocation4], 32  }
 0xa3c   :  { %1036 = vsyncadd [#allocation4], 4294967264 }
 0xa3d   :  { %750 = vsyncpa [#allocation3], 1 }
 0xa3e   :  { %751 = vsyncpa [#allocation6], 1 }
 0xa3f   :  { %752 = vsyncpa [#allocation9], 1 }
 0xa40   :  { %753 = vsyncpa [#allocation12], 1 }
 0xa41   :  { %754 = vsyncpa [#allocation15], 1 }
 0xa42   :  { %755 = vsyncpa [#allocation4], 1 }

</bundles_post_ra>
